<compile_context>
chip_gen: v6e
topology: v6e:2x2x1
jax: 0.10.0
libtpu: 0.0.40
codegen_flags: <defaults>
</compile_context>

<pallas_src>
import functools

import jax
import jax.numpy as jnp
from jax.experimental import pallas as pl
from jax.experimental.pallas import tpu as pltpu


def _pow_static(x, gamma):
    """x ** gamma with a cheap VPU path for small non-negative integer gamma."""
    g = float(gamma)
    if g == int(g) and 0.0 <= g <= 4.0:
        n = int(g)
        if n == 0:
            return jnp.ones_like(x)
        acc = x
        for _ in range(n - 1):
            acc = acc * x
        return acc
    return jnp.power(x, g)  # general fallback (exp/log on EUP)


def _mixed_loss2_kernel(pred_ref, tgt_ref, out_ref, *, alpha, gamma,
                        sample_weight, eps):
    pred = pred_ref[...]                      # (N, C) probabilities (focal path uses as-is)
    tgt = tgt_ref[...]                        # (N, 1) int32 raw labels in [0, C]
    N, C = pred.shape

    yt = tgt.astype(jnp.float32)              # (N, 1) raw label value as float
    # one-hot(target, C+1)[:, :C] built in-kernel: label == C matches nothing -> all-zero row.
    cls = jax.lax.broadcasted_iota(jnp.int32, (N, C), 1)
    t = (cls == tgt).astype(jnp.float32)      # (N, C)

    # ---- JaccardLoss('binary')  (smp defaults: from_logits=True, smooth=0, eps=1e-7) ----
    # y_pred.view(N,1,-1) = sigmoid(pred); y_true.view(N,1,-1) = raw label value broadcast.
    p_sig = jax.nn.sigmoid(pred)
    row_sig = jnp.sum(p_sig, axis=-1, keepdims=True)   # (N, 1) lane reduce (single XLU pass)
    sum_yt = jnp.sum(yt)
    inter = jnp.sum(row_sig * yt)                      # == sum(p_sig * yt_broadcast)
    card = jnp.sum(row_sig) + float(C) * sum_yt        # == sum(p_sig + yt_broadcast)
    union = card - inter
    score = inter / jnp.maximum(union, eps)
    mask = (sum_yt > 0.0).astype(jnp.float32)
    jac_loss = (1.0 - score) * mask                    # .mean() over one class is identity

    # ---- py_focal_loss_with_prob (pred already a probability) ----
    pt = pred + t * (1.0 - 2.0 * pred)                 # == (1-pred)*t + pred*(1-t)
    ptg = _pow_static(pt, gamma)                       # gamma=2.0 -> pt*pt (no EUP pow)
    focal_w = ((1.0 - alpha) + (2.0 * alpha - 1.0) * t) * ptg
    # F.binary_cross_entropy clamps each log term at -100
    log_p = jnp.maximum(jnp.log(pred), -100.0)
    log_1mp = jnp.maximum(jnp.log(1.0 - pred), -100.0)
    bce = t * (log_1mp - log_p) - log_1mp              # == -(t*log_p + (1-t)*log_1mp)

    per_row = jnp.sum(bce * focal_w, axis=-1, keepdims=True)   # (N, 1)

    # Per-sample weight (module hardcodes [4.0, 1.0]) baked as a compile-time constant.
    row = jax.lax.broadcasted_iota(jnp.int32, (N, 1), 0)
    w_col = jnp.full((N, 1), float(sample_weight[-1]), dtype=jnp.float32)
    for i in range(len(sample_weight) - 1):
        w_col = jnp.where(row == i, float(sample_weight[i]), w_col)

    inv_n_elems = 1.0 / float(N * C)
    focal_loss = jnp.sum(per_row * w_col) * inv_n_elems        # reduction='mean'

    out_ref[0, 0] = jac_loss + focal_loss


def mixed_loss2(pred, target, sample_weight=(4.0, 1.0), *, alpha=0.25, gamma=2.0):
    """pred: (N, C) f32 probabilities, target: (N,) int32 labels in [0, C],
    sample_weight: static per-sample weights (== torch.tensor([4.0, 1.0]) in the module)."""
    N, C = pred.shape
    pred = pred.astype(jnp.float32)
    tgt = target.astype(jnp.int32).reshape(N, 1)
    sw = tuple(float(v) for v in sample_weight)
    assert len(sw) == N, "per-sample weight length must match N"

    kernel = functools.partial(_mixed_loss2_kernel,
                               alpha=float(alpha), gamma=float(gamma),
                               sample_weight=sw, eps=1e-7)
    out = pl.pallas_call(
        kernel,
        out_shape=jax.ShapeDtypeStruct((1, 1), jnp.float32),
        in_specs=[
            pl.BlockSpec(memory_space=pltpu.MemorySpace.VMEM),  # pred   (N, C) f32
            pl.BlockSpec(memory_space=pltpu.MemorySpace.VMEM),  # target (N, 1) int32
        ],
        out_specs=pl.BlockSpec(memory_space=pltpu.MemorySpace.SMEM),
    )(pred, tgt)
    return out[0, 0]


def _reference(pred, target, sample_weight, alpha=0.25, gamma=2.0, eps=1e-7):
    """Pure-JAX mirror of the PyTorch forward (for a quick sanity check)."""
    N, C = pred.shape
    p_sig = jax.nn.sigmoid(pred)
    yt = target.astype(jnp.float32).reshape(N, 1)
    inter = jnp.sum(p_sig * yt)
    union = jnp.sum(p_sig + yt) - inter
    score = inter / jnp.maximum(union, eps)
    jac = (1.0 - score) * (jnp.sum(yt) > 0).astype(jnp.float32)

    t = jax.nn.one_hot(target, C + 1, dtype=jnp.float32)[:, :C]
    pt = (1 - pred) * t + pred * (1 - t)
    fw = (alpha * t + (1 - alpha) * (1 - t)) * pt ** gamma
    bce = -(t * jnp.maximum(jnp.log(pred), -100.0)
            + (1 - t) * jnp.maximum(jnp.log(1 - pred), -100.0))
    focal = jnp.mean(bce * fw * jnp.asarray(sample_weight, jnp.float32).reshape(N, 1))
    return jac + focal


if __name__ == "__main__":
    key = jax.random.PRNGKey(0)
    k1, k2 = jax.random.split(key)

    N, C = 2, 4                       # N must be 2 (weight=[4.0, 1.0] is per-sample)
    # NOTE: focal path consumes `pred` directly as probabilities (module contract),
    # so the test inputs are probabilities in (0, 1).
    pred = jax.random.uniform(k1, (N, C), dtype=jnp.float32,
                              minval=0.05, maxval=0.95)
    target = jax.random.randint(k2, (N,), 0, C + 1, dtype=jnp.int32)  # labels in [0, C]
    sample_weight = (4.0, 1.0)

    alpha, gamma = 0.25, 2.0
    out = mixed_loss2(pred, target, sample_weight, alpha=alpha, gamma=gamma)
    out = jax.block_until_ready(out)

    ref = _reference(pred, target, sample_weight, alpha=alpha, gamma=gamma)
    assert jnp.allclose(out, ref, rtol=1e-5, atol=1e-5), (out, ref)

    print("KERNEL_OK")
</pallas_src>

<mosaic_0001>
module attributes {stable_mosaic.version = 11 : i64} {
  func.func @_mixed_loss2_kernel(%arg0: memref<2x4xf32, #tpu.memory_space<vmem>>, %arg1: memref<2x1xi32, #tpu.memory_space<vmem>>, %arg2: memref<1x1xf32, #tpu.memory_space<smem>>) attributes {dimension_semantics = [], scalar_prefetch = 0 : i64, scratch_operands = 0 : i64, tpu.core_type = #tpu.core_type<tc>} {
    %c0 = arith.constant 0 : index
    %c0_0 = arith.constant 0 : index
    %0 = vector.load %arg0[%c0, %c0_0] : memref<2x4xf32, #tpu.memory_space<vmem>>, vector<2x4xf32>
    %c0_1 = arith.constant 0 : index
    %c0_2 = arith.constant 0 : index
    %1 = vector.load %arg1[%c0_1, %c0_2] : memref<2x1xi32, #tpu.memory_space<vmem>>, vector<2x1xi32>
    %2 = arith.sitofp %1 : vector<2x1xi32> to vector<2x1xf32>
    %3 = tpu.iota {dimensions = array<i32: 1>} : vector<2x4xi32>
    %4 = vector.broadcast %1 : vector<2x1xi32> to vector<2x4xi32>
    %5 = arith.cmpi eq, %3, %4 : vector<2x4xi32>
    %6 = arith.extui %5 : vector<2x4xi1> to vector<2x4xi32>
    %7 = arith.sitofp %6 : vector<2x4xi32> to vector<2x4xf32>
    %8 = arith.negf %0 : vector<2x4xf32>
    %9 = math.exp %8 : vector<2x4xf32>
    %cst = arith.constant 1.000000e+00 : f32
    %10 = vector.broadcast %cst : f32 to vector<2x4xf32>
    %11 = arith.addf %10, %9 : vector<2x4xf32>
    %12 = arith.divf %10, %11 : vector<2x4xf32>
    %cst_3 = arith.constant dense<0.000000e+00> : vector<2xf32>
    %13 = vector.multi_reduction <add>, %12, %cst_3 [1] : vector<2x4xf32> to vector<2xf32>
    %14 = vector.shape_cast %13 : vector<2xf32> to vector<2x1xf32>
    %15 = vector.shape_cast %2 : vector<2x1xf32> to vector<1x2x1xf32>
    %cst_4 = arith.constant dense<0.000000e+00> : vector<1xf32>
    %16 = vector.multi_reduction <add>, %15, %cst_4 [1, 2] : vector<1x2x1xf32> to vector<1xf32>
    %17 = vector.shape_cast %16 : vector<1xf32> to vector<1x1x1xf32>
    %18 = vector.extract %17[0, 0, 0] : f32 from vector<1x1x1xf32>
    %19 = arith.mulf %14, %2 : vector<2x1xf32>
    %20 = vector.shape_cast %19 : vector<2x1xf32> to vector<1x2x1xf32>
    %cst_5 = arith.constant dense<0.000000e+00> : vector<1xf32>
    %21 = vector.multi_reduction <add>, %20, %cst_5 [1, 2] : vector<1x2x1xf32> to vector<1xf32>
    %22 = vector.shape_cast %21 : vector<1xf32> to vector<1x1x1xf32>
    %23 = vector.extract %22[0, 0, 0] : f32 from vector<1x1x1xf32>
    %24 = vector.shape_cast %14 : vector<2x1xf32> to vector<1x2x1xf32>
    %cst_6 = arith.constant dense<0.000000e+00> : vector<1xf32>
    %25 = vector.multi_reduction <add>, %24, %cst_6 [1, 2] : vector<1x2x1xf32> to vector<1xf32>
    %26 = vector.shape_cast %25 : vector<1xf32> to vector<1x1x1xf32>
    %27 = vector.extract %26[0, 0, 0] : f32 from vector<1x1x1xf32>
    %cst_7 = arith.constant 4.000000e+00 : f32
    %28 = arith.mulf %cst_7, %18 : f32
    %29 = arith.addf %27, %28 : f32
    %30 = arith.subf %29, %23 : f32
    %cst_8 = arith.constant 1.000000e-07 : f32
    %31 = arith.maximumf %30, %cst_8 : f32
    %32 = arith.divf %23, %31 : f32
    %cst_9 = arith.constant 0.000000e+00 : f32
    %33 = arith.cmpf ogt, %18, %cst_9 : f32
    %34 = arith.extui %33 : i1 to i32
    %35 = arith.sitofp %34 : i32 to f32
    %cst_10 = arith.constant 1.000000e+00 : f32
    %36 = arith.subf %cst_10, %32 : f32
    %37 = arith.mulf %36, %35 : f32
    %cst_11 = arith.constant 2.000000e+00 : f32
    %38 = vector.broadcast %cst_11 : f32 to vector<2x4xf32>
    %39 = arith.mulf %38, %0 : vector<2x4xf32>
    %cst_12 = arith.constant 1.000000e+00 : f32
    %40 = vector.broadcast %cst_12 : f32 to vector<2x4xf32>
    %41 = arith.subf %40, %39 : vector<2x4xf32>
    %42 = arith.mulf %7, %41 : vector<2x4xf32>
    %43 = arith.addf %0, %42 : vector<2x4xf32>
    %44 = arith.mulf %43, %43 : vector<2x4xf32>
    %cst_13 = arith.constant -5.000000e-01 : f32
    %45 = vector.broadcast %cst_13 : f32 to vector<2x4xf32>
    %46 = arith.mulf %45, %7 : vector<2x4xf32>
    %cst_14 = arith.constant 7.500000e-01 : f32
    %47 = vector.broadcast %cst_14 : f32 to vector<2x4xf32>
    %48 = arith.addf %47, %46 : vector<2x4xf32>
    %49 = arith.mulf %48, %44 : vector<2x4xf32>
    %50 = math.log %0 : vector<2x4xf32>
    %cst_15 = arith.constant -1.000000e+02 : f32
    %51 = vector.broadcast %cst_15 : f32 to vector<2x4xf32>
    %52 = arith.maximumf %50, %51 : vector<2x4xf32>
    %cst_16 = arith.constant 1.000000e+00 : f32
    %53 = vector.broadcast %cst_16 : f32 to vector<2x4xf32>
    %54 = arith.subf %53, %0 : vector<2x4xf32>
    %55 = math.log %54 : vector<2x4xf32>
    %cst_17 = arith.constant -1.000000e+02 : f32
    %56 = vector.broadcast %cst_17 : f32 to vector<2x4xf32>
    %57 = arith.maximumf %55, %56 : vector<2x4xf32>
    %58 = arith.subf %57, %52 : vector<2x4xf32>
    %59 = arith.mulf %7, %58 : vector<2x4xf32>
    %60 = arith.subf %59, %57 : vector<2x4xf32>
    %61 = arith.mulf %60, %49 : vector<2x4xf32>
    %cst_18 = arith.constant dense<0.000000e+00> : vector<2xf32>
    %62 = vector.multi_reduction <add>, %61, %cst_18 [1] : vector<2x4xf32> to vector<2xf32>
    %63 = vector.shape_cast %62 : vector<2xf32> to vector<2x1xf32>
    %64 = tpu.iota {dimensions = array<i32: 0>} : vector<2x1xi32>
    %cst_19 = arith.constant 1.000000e+00 : f32
    %65 = vector.broadcast %cst_19 : f32 to vector<2x1xf32>
    %c0_i32 = arith.constant 0 : i32
    %66 = vector.broadcast %c0_i32 : i32 to vector<2x1xi32>
    %67 = arith.cmpi eq, %64, %66 : vector<2x1xi32>
    %cst_20 = arith.constant 4.000000e+00 : f32
    %68 = vector.broadcast %cst_20 : f32 to vector<2x1xf32>
    %69 = arith.select %67, %68, %65 : vector<2x1xi1>, vector<2x1xf32>
    %70 = arith.mulf %63, %69 : vector<2x1xf32>
    %71 = vector.shape_cast %70 : vector<2x1xf32> to vector<1x2x1xf32>
    %cst_21 = arith.constant dense<0.000000e+00> : vector<1xf32>
    %72 = vector.multi_reduction <add>, %71, %cst_21 [1, 2] : vector<1x2x1xf32> to vector<1xf32>
    %73 = vector.shape_cast %72 : vector<1xf32> to vector<1x1x1xf32>
    %74 = vector.extract %73[0, 0, 0] : f32 from vector<1x1x1xf32>
    %cst_22 = arith.constant 1.250000e-01 : f32
    %75 = arith.mulf %74, %cst_22 : f32
    %76 = arith.addf %37, %75 : f32
    %c0_23 = arith.constant 0 : index
    %c0_24 = arith.constant 0 : index
    %77 = memref.load %arg2[%c0_23, %c0_24] : memref<1x1xf32, #tpu.memory_space<smem>>
    memref.store %76, %arg2[%c0_23, %c0_24] : memref<1x1xf32, #tpu.memory_space<smem>>
    return
  }
}

</mosaic_0001>

<bundles_post_ra>
// kernel: tpu_custom_call.1
= control target key start
LH: loop header
LB: loop body
LE: loop exit
PB: predicated region body
PF: predicated region fallthrough
CT: control target
= control target key end

     0   :  { %v170_v2 = vmov 0   ;;  %s205_s0 = inlined_call_operand.vmem [shape: f32[2,4], index: 0, kind: input, shape index: {}]   ;;  %s206_s1 = inlined_call_operand.vmem [shape: s32[2,1], index: 1, kind: input, shape index: {}]   ;;  %s207_s2 = inlined_call_operand.hbm [shape: f32[1,1], index: 2, kind: output, shape index: {}]  }
   0x1   :  { %v13_v0 = vld [vmem:[%s206_s1] sm:$0x3]  ;;  %149 = vset.pattern.permute.xlu0 %v170_v2 }
   0x2   :  { %v12_v1 = vld [vmem:[%s205_s0] sm:$0x3]  ;;  %v14_v3 = vcvt.s32.f32 %v13_v0 }
   0x3   :  { %v133_v4 = vmul.f32 -1.442695, %v12_v1 }
   0x4   :  { %7 = vsyncpa [#allocation3], 0  ;;  %18 = vperm.xlu0 %149, %v13_v0   ;;  %vm33_vm0 = vcmask 1024   ;;  %vm29_vm1 = vcmask 25600   ;;  %v89_v10 = vsub.f32 1.0, %v12_v1  ;;  %v15_v11 = vlaneseq  ;;  %s174_s28 = smov [#allocation2]  }
   0x5   :  { %150 = vpow2.f32 %v133_v4  ;;  %v34_v5 = vsel %vm33_vm0, %v14_v3, 0.0  ;;  %v78_v14 = vmul.f32 2.0, %v12_v1  ;;  %v171_v18 = vmov 0.0   ;;  %s173_s17 = smov 1e-07  }
   0x6   :  { %35 = vadd.xlane.f32.xlu1 %v34_v5  ;;  %v16_v12 = vand.u32 127, %v15_v11  ;;  %v101_v46 = vshrl.u32 %v15_v11, 7  ;;  %v172_v53 = vmov 1.0  }
   0x7   :  { %v79_v17 = vsub.f32 1.0, %v78_v14 }
   0x8   :  { %vm102_vm3 = vcmp.eq.s32.totalorder %v101_v46, 0 }
   0x9   :  { %v103_v54 = vsel %vm102_vm3, 4.0, %v172_v53 }
  0x12   :  { %v151_v6 = vpop.eup %150 }
  0x13   :  { %v26_v7 = vadd.f32 1.0, %v151_v6 }
  0x15   :  { %152 = vrcp.f32 %v26_v7 }
  0x16   :  { %154 = vlog2.f32 %v12_v1 }
  0x17   :  { %156 = vlog2.f32 %v89_v10 }
  0x22   :  { %v153_v8 = vpop.eup %152 }
  0x23   :  { %v30_v9 = vsel %vm29_vm1, %v153_v8, 0.0  ;;  %v155_v15 = vpop.eup %154 }
  0x24   :  { %31 = vadd.xlane.f32.xlu0 %v30_v9  ;;  %v157_v16 = vpop.eup %156  ;;  %v87_v20 = vmul.f32 0.6931472, %v155_v15 }
  0x25   :  { %v91_v21 = vmul.f32 0.6931472, %v157_v16 }
  0x26   :  { %v88_v23 = vmax.f32 %v87_v20, -100.0 }
  0x27   :  { %v92_v24 = vmax.f32 %v91_v21, -100.0 }
  0x29   :  { %v93_v28 = vsub.f32 %v92_v24, %v88_v23 }
  0x7f   :  { %v19_v13 = vpop.permute.xlu0 %18 }
  0x80   :  { %vm20_vm2 = vcmp.eq.s32.totalorder %v16_v12, %v19_v13 }
  0x81   :  { %v132_v19 = vsel %vm20_vm2, 1.0, %v171_v18 }
  0x82   :  { %v80_v22 = vmul.f32 %v132_v19, %v79_v17  ;;  %v83_v26 = vmul.f32 -0.5, %v132_v19  ;;  %v94_v32 = vmul.f32 %v132_v19, %v93_v28 }
  0x84   :  { %v81_v25 = vadd.f32 %v80_v22, %v12_v1  ;;  %v84_v31 = vadd.f32 0.75, %v83_v26  ;;  %v95_v38 = vsub.f32 %v94_v32, %v92_v24 }
  0x86   :  { %v82_v30 = vmul.f32 %v81_v25, %v81_v25 }
  0x88   :  { %v85_v37 = vmul.f32 %v84_v31, %v82_v30 }
  0x8a   :  { %v96_v41 = vmul.f32 %v95_v38, %v85_v37 }
  0x8c   :  { %v97_v43 = vsel %vm29_vm1, %v96_v41, 0.0 }
  0x8f   :  { %v36_v27 = vpop.xlane.xlu1 %35 }
  0x90   :  { %v37_v29 = vrot.slane %v36_v27, 4 }
  0x92   :  { %v38_v34 = vadd.f32 %v37_v29, %v36_v27 }
  0x94   :  { %v39_v39 = vrot.slane %v38_v34, 2 }
  0x96   :  { %v40_v42 = vadd.f32 %v39_v39, %v38_v34 }
  0x98   :  { %v41_v44 = vrot.slane %v40_v42, 1 }
  0x9a   :  { %v42_v45 = vadd.f32 %v41_v44, %v40_v42 }
  0x9c   :  { %134 = vpush %v42_v45 }
  0xad   :  { %v32_v33 = vpop.xlane.xlu0 %31 }
  0xae   :  { %v44_v35 = vmul.f32 %v32_v33, %v14_v3  ;;  %v55_v36 = vsel %vm33_vm0, %v32_v33, 0.0 }
  0xaf   :  { %56 = vadd.xlane.f32.xlu1 %v55_v36 }
  0xb0   :  { %v45_v40 = vsel %vm33_vm0, %v44_v35, 0.0 }
  0xb3   :  { %46 = vadd.xlane.f32.xlu1 %v45_v40 }
  0xb7   :  { %98 = vadd.xlane.f32.xlu1 %v97_v43 }
  0xcd   :  { %s135_s0 = spop %134 }
  0xce   :  { %s65_s1 = smul.f32 4.0, %s135_s0  ;;  %p73_p0 = scmp.gt.f32.partialorder %s135_s0, 0.0 }
  0xd0   :  { %s74_s21 = scalar_select %p73_p0, 1, 0 }
  0xd2   :  { %s75_s23 = scvt.s32.f32 %s74_s21 }
 0x138   :  { %v57_v47 = vpop.xlane.xlu1 %56 }
 0x139   :  { %v58_v48 = vrot.slane %v57_v47, 4 }
 0x13b   :  { %v59_v49 = vadd.f32 %v58_v48, %v57_v47 }
 0x13c   :  { %v47_v50 = vpop.xlane.xlu1 %46 }
 0x13d   :  { %v60_v51 = vrot.slane %v59_v49, 2  ;;  %v48_v52 = vrot.slane %v47_v50, 4 }
 0x13f   :  { %v49_v55 = vadd.f32 %v48_v52, %v47_v50  ;;  %v61_v57 = vadd.f32 %v60_v51, %v59_v49 }
 0x140   :  { %v99_v56 = vpop.xlane.xlu1 %98 }
 0x141   :  { %v50_v58 = vrot.slane %v49_v55, 2  ;;  %v104_v59 = vmul.f32 %v103_v54, %v99_v56  ;;  %v62_v62 = vrot.slane %v61_v57, 1 }
 0x143   :  { %v105_v60 = vsel %vm33_vm0, %v104_v59, 0.0  ;;  %v51_v61 = vadd.f32 %v50_v58, %v49_v55  ;;  %v63_v1 = vadd.f32 %v62_v62, %v61_v57 }
 0x144   :  { %106 = vadd.xlane.f32.xlu1 %v105_v60 }
 0x145   :  { %v52_v63 = vrot.slane %v51_v61, 1 }
 0x147   :  { %v53_v0 = vadd.f32 %v52_v63, %v51_v61 }
 0x149   :  { %136 = vpush %v53_v0 }
 0x14a   :  { %138 = vpush %v63_v1 }
 0x17a   :  { %s137_s13 = spop %136 }
 0x17b   :  { %s139_s14 = spop %138 }
 0x17c   :  { %s66_s15 = sadd.f32 %s139_s14, %s65_s1 }
 0x17e   :  { %s67_s16 = ssub.f32 %s66_s15, %s137_s13 }
 0x180   :  { %s68_s18 = smax.f32 %s173_s17, %s67_s16 }
 0x181   :  { %v69_v2 = vstv %s68_s18 }
 0x182   :  { %158 = vrcp.f32 %v69_v2 }
 0x18f   :  { %v159_v3 = vpop.eup %158 }
 0x190   :  { %140 = vpush %v159_v3 }
 0x1c1   :  { %s141_s19 = spop %140 }
 0x1c2   :  { %s72_s20 = smul.f32 %s141_s19, %s137_s13 }
 0x1c4   :  { %s76_s22 = ssub.f32 1.0, %s72_s20 }
 0x1c6   :  { %s77_s24 = smul.f32 %s76_s22, %s75_s23 }
 0x1cd   :  { %v107_v4 = vpop.xlane.xlu1 %106 }
 0x1ce   :  { %v108_v5 = vrot.slane %v107_v4, 4 }
 0x1d0   :  { %v109_v6 = vadd.f32 %v108_v5, %v107_v4 }
 0x1d2   :  { %v110_v7 = vrot.slane %v109_v6, 2 }
 0x1d4   :  { %v111_v8 = vadd.f32 %v110_v7, %v109_v6 }
 0x1d6   :  { %v112_v9 = vrot.slane %v111_v8, 1 }
 0x1d8   :  { %v113_v10 = vadd.f32 %v112_v9, %v111_v8 }
 0x1da   :  { %142 = vpush %v113_v10 }
 0x20b   :  { %s143_s25 = spop %142 }
 0x20c   :  { %s115_s26 = smul.f32 0.125, %s143_s25 }
 0x20e   :  { %s116_s27 = sadd.f32 %s115_s26, %s77_s24 }
 0x210   :  { %118 = sst [smem:[#allocation2]] %s116_s27 }
 0x211   :  { %126 = dma.smem_to_hbm %s174_s28, 16, %s207_s2, [#allocation3]  }
 0x212   :  { %168 = dma.done.wait [#allocation3], 16  }
 0x213   :  { %169 = vsyncadd [#allocation3], 4294967280 }
 0x214   :  { %130 = sfence }
 0x215   :  { %131 = vsyncpa [#allocation3], 1 }

</bundles_post_ra>
